<compile_context>
chip_gen: v7x
topology: tpu7x:2x2x1
jax: 0.10.0
libtpu: 0.0.40
codegen_flags: <defaults>
</compile_context>

<pallas_src>
import numpy as np
import jax
import jax.numpy as jnp
from jax.experimental import pallas as pl
from jax.experimental.pallas import tpu as pltpu


# ---------------------------------------------------------------------------
# Packed-parameter layout: one (P_ROWS, FPAD) buffer, every slice 8-row aligned
# ---------------------------------------------------------------------------
OBS_PAD = 8                     # obs_dim padded to one sublane group
FPAD = 128                      # lane-padded feature width (hidden / actions)
W1_OFF = 0                      # rows [0,   8):   W1, real block [0:obs_dim, 0:hidden]
B1_OFF = W1_OFF + OBS_PAD       # rows [8,  16):   b1 in row 8,   cols [0:hidden]
W2_OFF = B1_OFF + 8             # rows [16, 144):  W2, real block [0:hidden, 0:hidden]
B2_OFF = W2_OFF + FPAD          # rows [144,152):  b2 in row 144
W3_OFF = B2_OFF + 8             # rows [152,280):  W3, real block [0:hidden, 0:n_actions]
B3_OFF = W3_OFF + FPAD          # rows [280,288):  b3 in row 280
P_ROWS = B3_OFF + 8             # 288 (multiple of 8)

COMPUTE_DTYPE = jnp.bfloat16    # bf16 MXU operands on every generation (f32 accumulation)


# ---------------------------------------------------------------------------
# Kernel: one batch tile of the whole MLP (3 MXU matmuls + 2 EUP tanh).
# x_ref:   (TILE_B, OBS_PAD)  compute dtype (lane-compact, zero-padded obs)
# p_ref:   (P_ROWS, FPAD)     compute dtype packed parameters (VMEM-resident)
# out_ref: (TILE_B, FPAD)     compute dtype, lane-dense padded logits
# Padding exactness: padded lanes of x and padded rows/cols of every weight
# block are zeros, so padded lanes of h stay tanh(0)=0 through the network.
# ---------------------------------------------------------------------------
def qreps_policy_kernel(x_ref, p_ref, out_ref):
    x = x_ref[...]
    cdt = x.dtype

    w1 = p_ref[W1_OFF:W1_OFF + OBS_PAD, :]   # (8, 128)
    b1 = p_ref[B1_OFF:B1_OFF + 1, :]         # (1, 128)
    w2 = p_ref[W2_OFF:W2_OFF + FPAD, :]      # (128, 128)
    b2 = p_ref[B2_OFF:B2_OFF + 1, :]
    w3 = p_ref[W3_OFF:W3_OFF + FPAD, :]      # (128, 128)
    b3 = p_ref[B3_OFF:B3_OFF + 1, :]

    # layer 0: Linear + Tanh   (f32 accumulation; tanh runs in f32)
    h = jnp.dot(x, w1, preferred_element_type=jnp.float32) + b1
    h = jnp.tanh(h).astype(cdt)

    # hidden layer: Linear + Tanh   (num_hidden_layers = 1)
    h = jnp.dot(h, w2, preferred_element_type=jnp.float32) + b2
    h = jnp.tanh(h).astype(cdt)

    # output head: Linear, no activation (logits)
    logits = jnp.dot(h, w3, preferred_element_type=jnp.float32) + b3
    out_ref[...] = logits.astype(out_ref.dtype)


# ---------------------------------------------------------------------------
# Tile selection: biggest tile up to 512 rows; on v7x keep >= 2 grid steps so
# dimension_semantics=("parallel",) can shard batch tiles across both TCs.
# ---------------------------------------------------------------------------
def _round_up(n, m):
    return ((n + m - 1) // m) * m


def choose_tile_b(batch):
    b8 = max(_round_up(batch, 8), 8)
    kind = ""
    try:
        kind = jax.devices()[0].device_kind.lower()
    except Exception:
        pass
    two_cores = ("v7" in kind) or ("7x" in kind)
    if two_cores and b8 >= 16:
        return min(512, _round_up(pl.cdiv(b8, 2), 8))
    return min(512, b8)


# ---------------------------------------------------------------------------
# Wrapper: lane-compact input, parallel grid over batch tiles, slice + cast
# the real logits back out.
# ---------------------------------------------------------------------------
def qreps_policy_forward(x, packed_params, n_actions, tile_b=None):
    b, obs_dim = x.shape
    cdt = packed_params.dtype
    if tile_b is None:
        tile_b = choose_tile_b(b)
    bp = pl.cdiv(b, tile_b) * tile_b

    # lane-compact (OBS_PAD-wide) input; skip the pad when already aligned
    if bp == b and obs_dim == OBS_PAD and x.dtype == cdt:
        xp = x
    else:
        xp = jnp.zeros((bp, OBS_PAD), cdt).at[:b, :obs_dim].set(x.astype(cdt))

    out = pl.pallas_call(
        qreps_policy_kernel,
        out_shape=jax.ShapeDtypeStruct((bp, FPAD), cdt),
        grid=(bp // tile_b,),
        in_specs=[
            pl.BlockSpec((tile_b, OBS_PAD), lambda i: (i, 0)),   # batch tile
            pl.BlockSpec((P_ROWS, FPAD), lambda i: (0, 0)),      # weights: resident
        ],
        out_specs=pl.BlockSpec((tile_b, FPAD), lambda i: (i, 0)),
        compiler_params=pltpu.CompilerParams(
            dimension_semantics=("parallel",)),                  # v7x: shard over TCs
    )(xp, packed_params)

    return out[:b, :n_actions].astype(jnp.float32)


# ---------------------------------------------------------------------------
# Deterministic parameter init (orthogonal, gain sqrt(2) hidden / 0.01 head,
# zero biases) and packing into the single padded buffer.
# ---------------------------------------------------------------------------
def orthogonal(key, shape, gain):
    # shape = (in_features, out_features); orthogonalize like torch (out, in)
    out_f, in_f = shape[1], shape[0]
    a = np.asarray(jax.random.normal(key, (out_f, in_f), dtype=jnp.float32))
    q, r = np.linalg.qr(a.T if out_f < in_f else a)
    q = q * np.sign(np.diag(r))
    if out_f < in_f:
        q = q.T
    return (gain * q).T.astype(np.float32)   # return (in, out)


def init_params(key, obs_dim, hidden, n_actions, last_gain=0.01):
    k1, k2, k3 = jax.random.split(key, 3)
    g = float(np.sqrt(2.0))
    w1 = orthogonal(k1, (obs_dim, hidden), g)
    b1 = np.zeros((hidden,), np.float32)
    w2 = orthogonal(k2, (hidden, hidden), g)
    b2 = np.zeros((hidden,), np.float32)
    w3 = orthogonal(k3, (hidden, n_actions), last_gain)
    b3 = np.zeros((n_actions,), np.float32)
    return (w1, b1, w2, b2, w3, b3)


def pack_params(params, obs_dim, hidden, n_actions):
    w1, b1, w2, b2, w3, b3 = (np.asarray(p, dtype=np.float32) for p in params)
    P = np.zeros((P_ROWS, FPAD), np.float32)
    P[W1_OFF:W1_OFF + obs_dim, :hidden] = w1
    P[B1_OFF, :hidden] = b1.reshape(-1)
    P[W2_OFF:W2_OFF + hidden, :hidden] = w2
    P[B2_OFF, :hidden] = b2.reshape(-1)
    P[W3_OFF:W3_OFF + hidden, :n_actions] = w3
    P[B3_OFF, :n_actions] = b3.reshape(-1)
    return jnp.asarray(P)


def reference_forward(x, params):
    w1, b1, w2, b2, w3, b3 = (jnp.asarray(p, dtype=jnp.float32) for p in params)
    h = jnp.tanh(x @ w1 + b1)
    h = jnp.tanh(h @ w2 + b2)
    return h @ w3 + b3


if __name__ == "__main__":
    batch, obs_dim, hidden, n_actions = 256, 4, 32, 4

    key = jax.random.PRNGKey(0)
    kx, kp = jax.random.split(key)
    x = jax.random.normal(kx, (batch, obs_dim), dtype=jnp.float32)
    params = init_params(kp, obs_dim, hidden, n_actions)
    packed = pack_params(params, obs_dim, hidden, n_actions).astype(COMPUTE_DTYPE)

    logits = qreps_policy_forward(x, packed, n_actions)
    logits = jax.block_until_ready(logits)

    ref = reference_forward(x, params)
    # bf16 operands / bf16 writeback, f32 accumulation on the MXU path
    np.testing.assert_allclose(np.asarray(logits), np.asarray(ref),
                               rtol=5e-2, atol=1e-2)
    print("KERNEL_OK")
</pallas_src>

<mosaic_0001>
module attributes {stable_mosaic.version = 11 : i64} {
  func.func @qreps_policy_kernel(%arg0: i32, %arg1: memref<256x8xbf16, #tpu.memory_space<vmem>>, %arg2: memref<288x128xbf16, #tpu.memory_space<vmem>>, %arg3: memref<256x128xbf16, #tpu.memory_space<vmem>>) attributes {dimension_semantics = [#tpu.dimension_semantics<parallel>], iteration_bounds = array<i64: 1>, scalar_prefetch = 0 : i64, scratch_operands = 0 : i64, tpu.core_type = #tpu.core_type<tc>, window_params = [{transform_indices = @transform_0, window_bounds = array<i64: 256, 8>}, {pipeline_mode = #tpu.pipeline_mode<synchronous>, transform_indices = @transform_1, window_bounds = array<i64: 288, 128>}, {transform_indices = @transform_2, window_bounds = array<i64: 256, 128>}]} {
    %c0 = arith.constant 0 : index
    %c0_0 = arith.constant 0 : index
    %0 = vector.load %arg1[%c0, %c0_0] : memref<256x8xbf16, #tpu.memory_space<vmem>>, vector<256x8xbf16>
    %c0_1 = arith.constant 0 : index
    %c0_2 = arith.constant 0 : index
    %1 = vector.load %arg2[%c0_1, %c0_2] : memref<288x128xbf16, #tpu.memory_space<vmem>>, vector<8x128xbf16>
    %c8 = arith.constant 8 : index
    %c0_3 = arith.constant 0 : index
    %2 = vector.load %arg2[%c8, %c0_3] : memref<288x128xbf16, #tpu.memory_space<vmem>>, vector<1x128xbf16>
    %c16 = arith.constant 16 : index
    %c0_4 = arith.constant 0 : index
    %3 = vector.load %arg2[%c16, %c0_4] : memref<288x128xbf16, #tpu.memory_space<vmem>>, vector<128x128xbf16>
    %c144 = arith.constant 144 : index
    %c0_5 = arith.constant 0 : index
    %4 = vector.load %arg2[%c144, %c0_5] : memref<288x128xbf16, #tpu.memory_space<vmem>>, vector<1x128xbf16>
    %c152 = arith.constant 152 : index
    %c0_6 = arith.constant 0 : index
    %5 = vector.load %arg2[%c152, %c0_6] : memref<288x128xbf16, #tpu.memory_space<vmem>>, vector<128x128xbf16>
    %c280 = arith.constant 280 : index
    %c0_7 = arith.constant 0 : index
    %6 = vector.load %arg2[%c280, %c0_7] : memref<288x128xbf16, #tpu.memory_space<vmem>>, vector<1x128xbf16>
    %cst = arith.constant dense<0.000000e+00> : vector<256x128xf32>
    %7 = tpu.matmul %0, %1, %cst {dimension_numbers = #tpu.dot_dimension_numbers<[1], [0], [0], [1], [0, 0, 1, 1], [], []>} : vector<256x8xbf16>, vector<8x128xbf16>, vector<256x128xf32> -> vector<256x128xf32>
    %8 = arith.extf %2 : vector<1x128xbf16> to vector<1x128xf32>
    %9 = vector.broadcast %8 : vector<1x128xf32> to vector<256x128xf32>
    %10 = arith.addf %7, %9 : vector<256x128xf32>
    %11 = math.tanh %10 : vector<256x128xf32>
    %12 = arith.truncf %11 : vector<256x128xf32> to vector<256x128xbf16>
    %cst_8 = arith.constant dense<0.000000e+00> : vector<256x128xf32>
    %13 = tpu.matmul %12, %3, %cst_8 {dimension_numbers = #tpu.dot_dimension_numbers<[1], [0], [0], [1], [0, 0, 1, 1], [], []>} : vector<256x128xbf16>, vector<128x128xbf16>, vector<256x128xf32> -> vector<256x128xf32>
    %14 = arith.extf %4 : vector<1x128xbf16> to vector<1x128xf32>
    %15 = vector.broadcast %14 : vector<1x128xf32> to vector<256x128xf32>
    %16 = arith.addf %13, %15 : vector<256x128xf32>
    %17 = math.tanh %16 : vector<256x128xf32>
    %18 = arith.truncf %17 : vector<256x128xf32> to vector<256x128xbf16>
    %cst_9 = arith.constant dense<0.000000e+00> : vector<256x128xf32>
    %19 = tpu.matmul %18, %5, %cst_9 {dimension_numbers = #tpu.dot_dimension_numbers<[1], [0], [0], [1], [0, 0, 1, 1], [], []>} : vector<256x128xbf16>, vector<128x128xbf16>, vector<256x128xf32> -> vector<256x128xf32>
    %20 = arith.extf %6 : vector<1x128xbf16> to vector<1x128xf32>
    %21 = vector.broadcast %20 : vector<1x128xf32> to vector<256x128xf32>
    %22 = arith.addf %19, %21 : vector<256x128xf32>
    %23 = arith.truncf %22 : vector<256x128xf32> to vector<256x128xbf16>
    %c0_10 = arith.constant 0 : index
    %c0_11 = arith.constant 0 : index
    %24 = vector.load %arg3[%c0_10, %c0_11] : memref<256x128xbf16, #tpu.memory_space<vmem>>, vector<256x128xbf16>
    tpu.vector_store %arg3[%c0_10, %c0_11], %23 {strides = array<i32>} : memref<256x128xbf16, #tpu.memory_space<vmem>>, vector<256x128xbf16>,
    return
  }
  func.func @transform_0(%arg0: i32) -> (i32, i32) {
    %c0_i32 = arith.constant 0 : i32
    %c0_i32_0 = arith.constant 0 : i32
    return %arg0, %c0_i32 : i32, i32
  }
  func.func @transform_1(%arg0: i32) -> (i32, i32) {
    %c0_i32 = arith.constant 0 : i32
    %c0_i32_0 = arith.constant 0 : i32
    %c0_i32_1 = arith.constant 0 : i32
    return %c0_i32, %c0_i32_0 : i32, i32
  }
  func.func @transform_2(%arg0: i32) -> (i32, i32) {
    %c0_i32 = arith.constant 0 : i32
    %c0_i32_0 = arith.constant 0 : i32
    return %arg0, %c0_i32 : i32, i32
  }
}

</mosaic_0001>

<bundles_post_ra>
// kernel: tpu_custom_call.1
= control target key start
LH: loop header
LB: loop body
LE: loop exit
PB: predicated region body
PF: predicated region fallthrough
CT: control target
= control target key end

     0   :  { %7 = vsyncpa [#allocation3], 0  ;;  %s1942_s0 = inlined_call_operand.vmem [shape: bf16[256,8], index: 0, kind: input, shape index: {}]   ;;  %s1943_s1 = inlined_call_operand.hbm [shape: bf16[288,128], index: 1, kind: input, shape index: {}]   ;;  %s1944_s2 = inlined_call_operand.hbm [shape: bf16[256,128], index: 2, kind: output, shape index: {}]  }
   0x1   :  { %8 = vsyncpa [#allocation4], 0  ;;  %s1713_s9 = smov [#allocation2]   ;;  %s1665_s13 = scalar_lea.hbm %s1943_s1, 2304 }
   0x2   :  { %s16_s10 = sshll.u32 %s1713_s9, 4  ;;  %p1666_p0 = scmp.ne.s32.totalorder %s1943_s1, %s1665_s13  ;;  %s17_s10 = int_to_ptr.vmem [resolvable:$true] %s16_s10 }
   0x3   :  { %p1669_p1 = scmp.lt.u32.totalorder %s1665_s13, %s1943_s1 }
   0x5   :  { %p1671_p2 = pnand %p1669_p1, %p1666_p0 }
   0x7   :  { %1674 = shalt.err (!%p1671_p2)
}
   0x8   :  { %s1675_s18 = scalar_lea.vmem %s17_s10, 2304  ;;  %p1680_p4 = scmp.lt.s32.totalorder %s17_s10, %s17_s10 }
   0x9   :  { %p1676_p3 = scmp.ne.s32.totalorder %s17_s10, %s1675_s18  ;;  %p1681_p5 = scmp.lt.s32.totalorder %s1675_s18, %s1675_s18 }
   0xb   :  { %p1682_p6 = por %p1681_p5, %p1680_p4 }
   0xd   :  { %p1683_p7 = pnand %p1682_p6, %p1676_p3 }
   0xf   :  { %1686 = shalt.err (!%p1683_p7)
}
  0x10   :  { %s1714_s19 = smov 64   ;;  %s1715_s20 = smov 4  }
  0x11   :  { %22 = dma.hbm_to_vmem [thread:$0]  %s1943_s1, 2304, %s17_s10, [#allocation3], %s1714_s19, %s1714_s19, %s1715_s20  }
  0x12   :  { %1709 = dma.done.wait [#allocation3], 2304  }
  0x13   :  { %1710 = vsyncadd [#allocation3], 4294964992  ;;  %vm229_vm0 = vcmask 1043456   ;;  %vm180_vm1 = vcmask 64512   ;;  %v59_v0 = vld [vmem:[#allocation2] sm:$0xf]  ;;  %v96_v30 = vlaneseq }
  0x14   :  { %1499 = vmatprep.subr.msk.bf16.mxu0 %vm229_vm0, %v59_v0  ;;  %v231_v1 = vsel %vm229_vm0, %v59_v0, 0  ;;  %v1505_v2 = vld [vmem:[%s1942_s0] sm:$0xff]   ;;  %1500 = vmatprep.subr.msk.bf16.mxu1 %vm229_vm0, %v59_v0  ;;  %v1506_v3 = vld [vmem:[%s1942_s0 + $0x8] sm:$0xff]   ;;  %v1507_v4 = vld [vmem:[%s1942_s0 + $0x10] sm:$0xff]  }
  0x15   :  { %1368 = vmatpush3.bf16.msra.mxu0 %v231_v1  ;;  %1498 = vmatpush3.bf16.msra.mxu1 %v231_v1  ;;  %v1508_v5 = vld [vmem:[%s1942_s0 + $0x18] sm:$0xff]   ;;  %v1509_v6 = vld [vmem:[%s1942_s0 + $0x20] sm:$0xff]   ;;  %v1514_v8 = vld [vmem:[%s1942_s0 + $0x48] sm:$0xff]   ;;  %v97_v31 = vshrl.u32 %v96_v30, 7 }
  0x16   :  { %1369 = vmatprep.mubr.msk.bf16.mxu0 %vm180_vm1, %v1505_v2  ;;  %v1513_v7 = vld [vmem:[%s1942_s0 + $0x40] sm:$0xff]   ;;  %v1515_v9 = vld [vmem:[%s1942_s0 + $0x50] sm:$0xff]   ;;  %v1510_v10 = vld [vmem:[%s1942_s0 + $0x28] sm:$0xff]  }
  0x17   :  { %1385 = vmatprep.mubr.msk.bf16.mxu1 %vm180_vm1, %v1513_v7  ;;  %v1516_v11 = vld [vmem:[%s1942_s0 + $0x58] sm:$0xff]   ;;  %v1517_v12 = vld [vmem:[%s1942_s0 + $0x60] sm:$0xff]   ;;  %v1521_v13 = vld [vmem:[#allocation2 + $0x8] sm:$0xff]   ;;  %v1811_v34 = vsub.s32 0, %v97_v31 }
  0x18   :  { %1370 = vmatmul.mubr.msk.bf16.vlgmr.msra.gmra.mrb[0].mxu0 %vm180_vm1, %v1506_v3  ;;  %1386 = vmatmul.mubr.msk.bf16.vlgmr.msra.gmra.mrb[0].mxu1 %vm180_vm1, %v1514_v8  ;;  %v1511_v14 = vld [vmem:[%s1942_s0 + $0x30] sm:$0xff]   ;;  %v1523_v16 = vld [vmem:[#allocation2 + $0x18] sm:$0xff]   ;;  %v1518_v17 = vld [vmem:[%s1942_s0 + $0x68] sm:$0xff]  }
  0x19   :  { %1373 = vmatprep.mubr.msk.bf16.mxu0 %vm180_vm1, %v1507_v4  ;;  %1389 = vmatprep.mubr.msk.bf16.mxu1 %vm180_vm1, %v1515_v9  ;;  %v1522_v15 = vld [vmem:[#allocation2 + $0x10] sm:$0xff]   ;;  %v1512_v18 = vld [vmem:[%s1942_s0 + $0x38] sm:$0xff]   ;;  %v1524_v20 = vld [vmem:[#allocation2 + $0x20] sm:$0xff]  }
  0x1a   :  { %1401 = vmatprep.subr.bf16.mxu1 %v1521_v13  ;;  %v1519_v19 = vld [vmem:[%s1942_s0 + $0x70] sm:$0xff]   ;;  %v1520_v21 = vld [vmem:[%s1942_s0 + $0x78] sm:$0xff]   ;;  %v1525_v22 = vld [vmem:[#allocation2 + $0x28] sm:$0xff]   ;;  %s1716_s0 = smov [#allocation5]  }
  0x1b   :  { %1402 = vmatpush3.bf16.msra.mxu1 %v1521_v13  ;;  %v1526_v23 = vld [vmem:[#allocation2 + $0x30] sm:$0xff]   ;;  %v1527_v24 = vld [vmem:[#allocation2 + $0x38] sm:$0xff]   ;;  %v1528_v25 = vld [vmem:[#allocation2 + $0x40] sm:$0xff]   ;;  %s1083_s27 = sshll.u32 %s1716_s0, 4  ;;  %s1084_s27 = int_to_ptr.vmem [resolvable:$true] %s1083_s27 }
  0x1c   :  { %1403 = vmatprep.subr.bf16.mxu1 %v1522_v15  ;;  %v1529_v26 = vld [vmem:[#allocation2 + $0x4c] sm:$0xff]   ;;  %v1530_v27 = vld [vmem:[#allocation2 + $0x54] sm:$0xff]   ;;  %v1531_v28 = vld [vmem:[#allocation2 + $0x5c] sm:$0xff]   ;;  %s1687_s28 = scalar_lea.vmem %s1084_s27, 2048  ;;  %p1692_p9 = scmp.lt.s32.totalorder %s1084_s27, %s1084_s27 }
  0x1d   :  { %1449 = vmatprep.subr.bf16.mxu0 %v1529_v26  ;;  %v1532_v29 = vld [vmem:[#allocation2 + $0x64] sm:$0xff]   ;;  %p1688_p8 = scmp.ne.s32.totalorder %s1084_s27, %s1687_s28  ;;  %p1693_p10 = scmp.lt.s32.totalorder %s1687_s28, %s1687_s28 }
  0x1e   :  { %1450 = vmatpush3.bf16.msra.mxu0 %v1529_v26  ;;  %v60_v32 = vld [vmem:[#allocation2 + $0x4] sm:$0x1] }
  0x1f   :  { %1404 = vmatpush3.bf16.msra.mxu1 %v1522_v15  ;;  %1451 = vmatprep.subr.bf16.mxu0 %v1530_v27  ;;  %v95_v33 = vunpack.c.l.bf16 %v60_v32  ;;  %p1694_p11 = por %p1693_p10, %p1692_p9 }
  0x20   :  { %1374 = vmatmul.mubr.msk.bf16.gmra.mrb[4].mxu0 %vm180_vm1, %v1508_v5  ;;  %1390 = vmatmul.mubr.msk.bf16.gmra.mrb[4].mxu1 %vm180_vm1, %v1516_v11 }
  0x21   :  { %1377 = vmatprep.mubr.msk.bf16.mxu0 %vm180_vm1, %v1509_v6  ;;  %1393 = vmatprep.mubr.msk.bf16.mxu1 %vm180_vm1, %v1517_v12  ;;  %v1814_v35 = vrot.slane %v95_v33, %v1811_v34  ;;  %p1695_p12 = pnand %p1694_p11, %p1688_p8 }
  0x22   :  { %1405 = vmatprep.subr.bf16.mxu1 %v1523_v16  ;;  %1452 = vmatpush3.bf16.msra.mxu0 %v1530_v27 }
  0x23   :  { %1406 = vmatpush3.bf16.msra.mxu1 %v1523_v16  ;;  %1453 = vmatprep.subr.bf16.mxu0 %v1531_v28 }
  0x24   :  { %1407 = vmatprep.subr.bf16.mxu1 %v1524_v20 }
  0x26   :  { %1454 = vmatpush3.bf16.msra.mxu0 %v1531_v28 }
  0x27   :  { %1408 = vmatpush3.bf16.msra.mxu1 %v1524_v20  ;;  %1455 = vmatprep.subr.bf16.mxu0 %v1532_v29 }
  0x28   :  { %1378 = vmatmul.mubr.msk.bf16.gmra.mrb[8].mxu0 %vm180_vm1, %v1510_v10  ;;  %1394 = vmatmul.mubr.msk.bf16.gmra.mrb[8].mxu1 %vm180_vm1, %v1518_v17 }
  0x29   :  { %1381 = vmatprep.mubr.msk.bf16.mxu0 %vm180_vm1, %v1511_v14  ;;  %1397 = vmatprep.mubr.msk.bf16.mxu1 %vm180_vm1, %v1519_v19 }
  0x2a   :  { %1409 = vmatprep.subr.bf16.mxu1 %v1525_v22  ;;  %1456 = vmatpush3.bf16.msra.mxu0 %v1532_v29 }
  0x2b   :  { %1410 = vmatpush3.bf16.msra.mxu1 %v1525_v22 }
  0x2c   :  { %1411 = vmatprep.subr.bf16.mxu1 %v1526_v23 }
  0x2f   :  { %1412 = vmatpush3.bf16.msra.mxu1 %v1526_v23 }
  0x30   :  { %1382 = vmatmul.mubr.msk.bf16.gmra.mrb[12].mxu0 %vm180_vm1, %v1512_v18  ;;  %1398 = vmatmul.mubr.msk.bf16.gmra.mrb[12].mxu1 %vm180_vm1, %v1520_v21 }
  0x31   :  { %1413 = vmatprep.subr.bf16.mxu1 %v1527_v24 }
  0x33   :  { %1414 = vmatpush3.bf16.msra.mxu1 %v1527_v24 }
  0x34   :  { %1415 = vmatprep.subr.bf16.mxu1 %v1528_v25 }
  0x37   :  { %1416 = vmatpush3.bf16.msra.mxu1 %v1528_v25 }
  0xeb   :  { %v1371_v36 = vpop.f32.mrb[0].mxu0  ;;  %v1387_v44 = vpop.f32.mrb[0].mxu1 }
  0xec   :  { %v276_v37 = vadd.f32 %v1371_v36, %v1814_v35  ;;  %v267_v38 = vpop.f32.mrb[1].mxu0  ;;  %v340_v46 = vadd.f32 %v1387_v44, %v1814_v35  ;;  %v331_v47 = vpop.f32.mrb[1].mxu1 }
  0xed   :  { %v268_v39 = vadd.f32 %v267_v38, %v1814_v35  ;;  %v1372_v40 = vpop.f32.mrb[2].mxu0  ;;  %v1388_v50 = vpop.f32.mrb[2].mxu1  ;;  %v332_v56 = vadd.f32 %v331_v47, %v1814_v35 }
  0xee   :  { %1537 = vtanh.f32 %v276_v37  ;;  %v279_v41 = vadd.f32 %v1372_v40, %v1814_v35  ;;  %v270_v42 = vpop.f32.mrb[3].mxu0  ;;  %v334_v53 = vpop.f32.mrb[3].mxu1  ;;  %v343_v58 = vadd.f32 %v1388_v50, %v1814_v35 }
  0xef   :  { %1539 = vtanh.f32 %v268_v39  ;;  %v271_v43 = vadd.f32 %v270_v42, %v1814_v35  ;;  %v335_v60 = vadd.f32 %v334_v53, %v1814_v35 }
  0xf0   :  { %1541 = vtanh.f32 %v279_v41 }
  0xf1   :  { %1543 = vtanh.f32 %v271_v43 }
  0xf2   :  { %1545 = vtanh.f32 %v340_v46 }
  0xf3   :  { %v1375_v45 = vpop.f32.mrb[4].mxu0  ;;  %v1391_v63 = vpop.f32.mrb[4].mxu1 }
  0xf4   :  { %v292_v48 = vadd.f32 %v1375_v45, %v1814_v35  ;;  %v283_v49 = vpop.f32.mrb[5].mxu0  ;;  %v356_v3 = vadd.f32 %v1391_v63, %v1814_v35  ;;  %v347_v4 = vpop.f32.mrb[5].mxu1 }
  0xf5   :  { %v284_v51 = vadd.f32 %v283_v49, %v1814_v35  ;;  %v1376_v52 = vpop.f32.mrb[6].mxu0  ;;  %v1392_v8 = vpop.f32.mrb[6].mxu1  ;;  %v348_v14 = vadd.f32 %v347_v4, %v1814_v35 }
  0xf6   :  { %1547 = vtanh.f32 %v292_v48  ;;  %v295_v54 = vadd.f32 %v1376_v52, %v1814_v35  ;;  %v286_v55 = vpop.f32.mrb[7].mxu0  ;;  %v350_v11 = vpop.f32.mrb[7].mxu1  ;;  %v359_v17 = vadd.f32 %v1392_v8, %v1814_v35 }
  0xf7   :  { %1549 = vtanh.f32 %v284_v51  ;;  %v287_v57 = vadd.f32 %v286_v55, %v1814_v35  ;;  %v351_v19 = vadd.f32 %v350_v11, %v1814_v35 }
  0xf8   :  { %v1538_v59 = vpop.eup %1537  ;;  %1551 = vtanh.f32 %v295_v54 }
  0xf9   :  { %v1540_v61 = vpop.eup %1539  ;;  %1553 = vtanh.f32 %v287_v57 }
  0xfa   :  { %v1542_v62 = vpop.eup %1541  ;;  %1555 = vtanh.f32 %v332_v56 }
  0xfb   :  { %v1544_v0 = vpop.eup %1543  ;;  %v1379_v1 = vpop.f32.mrb[8].mxu0  ;;  %v427_v2 = vpack.c.bf16 %v1542_v62, %v1538_v59  ;;  %1557 = vtanh.f32 %v343_v58 }
  0xfc   :  { %v308_v5 = vadd.f32 %v1379_v1, %v1814_v35  ;;  %v299_v6 = vpop.f32.mrb[9].mxu0  ;;  %v426_v7 = vpack.c.bf16 %v1544_v0, %v1540_v61  ;;  %1559 = vtanh.f32 %v335_v60  ;;  %v1833_v15 = vpop.eup %1545 }
  0xfd   :  { %v300_v9 = vadd.f32 %v299_v6, %v1814_v35  ;;  %v1380_v10 = vpop.f32.mrb[10].mxu0  ;;  %1561 = vtanh.f32 %v356_v3  ;;  %v1395_v22 = vpop.f32.mrb[8].mxu1 }
  0xfe   :  { %1563 = vtanh.f32 %v308_v5  ;;  %v311_v12 = vadd.f32 %v1380_v10, %v1814_v35  ;;  %v302_v13 = vpop.f32.mrb[11].mxu0  ;;  %1417 = vmatprep.mubr.bf16.mxu1 %v426_v7  ;;  %v372_v26 = vadd.f32 %v1395_v22, %v1814_v35  ;;  %v363_v27 = vpop.f32.mrb[9].mxu1  ;;  %v1534_v22 = vld [vmem:[#allocation2 + $0x74] sm:$0xff]  }
  0xff   :  { %1565 = vtanh.f32 %v300_v9  ;;  %v303_v16 = vadd.f32 %v302_v13, %v1814_v35  ;;  %1418 = vmatmul.mubr.bf16.vlgmr.msra.gmra.mrb[16].mxu1 %v427_v2  ;;  %v1396_v32 = vpop.f32.mrb[10].mxu1  ;;  %v364_v42 = vadd.f32 %v363_v27, %v1814_v35 }
 0x100   :  { %v1548_v18 = vpop.eup %1547  ;;  %1567 = vtanh.f32 %v311_v12  ;;  %v366_v38 = vpop.f32.mrb[11].mxu1  ;;  %v375_v46 = vadd.f32 %v1396_v32, %v1814_v35 }
 0x101   :  { %v1550_v20 = vpop.eup %1549  ;;  %1569 = vtanh.f32 %v303_v16  ;;  %v367_v49 = vadd.f32 %v366_v38, %v1814_v35 }
 0x102   :  { %v1552_v21 = vpop.eup %1551  ;;  %1571 = vtanh.f32 %v348_v14 }
 0x103   :  { %v1554_v23 = vpop.eup %1553  ;;  %v1383_v24 = vpop.f32.mrb[12].mxu0  ;;  %v429_v25 = vpack.c.bf16 %v1552_v21, %v1548_v18  ;;  %1573 = vtanh.f32 %v359_v17  ;;  %v1533_v21 = vld [vmem:[#allocation2 + $0x6c] sm:$0xff]  }
 0x104   :  { %v1839_v28 = vpop.eup %1555  ;;  %v324_v29 = vadd.f32 %v1383_v24, %v1814_v35  ;;  %v315_v30 = vpop.f32.mrb[13].mxu0  ;;  %v428_v31 = vpack.c.bf16 %v1554_v23, %v1550_v20  ;;  %1575 = vtanh.f32 %v351_v19  ;;  %1457 = vmatprep.subr.bf16.mxu0 %v1533_v21  ;;  %v1535_v23 = vld [vmem:[#allocation2 + $0x7c] sm:$0xff]   ;;  %v1536_v24 = vld [vmem:[#allocation2 + $0x84] sm:$0xff]  }
 0x105   :  { %v1842_v33 = vpop.eup %1557  ;;  %v316_v36 = vadd.f32 %v315_v30, %v1814_v35  ;;  %v1384_v37 = vpop.f32.mrb[14].mxu0  ;;  %1577 = vtanh.f32 %v372_v26  ;;  %1458 = vmatpush3.bf16.msra.mxu0 %v1533_v21 }
 0x106   :  { %v1560_v39 = vpop.eup %1559  ;;  %1579 = vtanh.f32 %v324_v29  ;;  %v327_v40 = vadd.f32 %v1384_v37, %v1814_v35  ;;  %v318_v41 = vpop.f32.mrb[15].mxu0  ;;  %1421 = vmatprep.mubr.bf16.mxu1 %v428_v31  ;;  %v435_v43 = vpack.c.bf16 %v1842_v33, %v1833_v15  ;;  %1459 = vmatprep.subr.bf16.mxu0 %v1534_v22 }
 0x107   :  { %v1562_v44 = vpop.eup %1561  ;;  %1581 = vtanh.f32 %v316_v36  ;;  %v319_v45 = vadd.f32 %v318_v41, %v1814_v35  ;;  %1422 = vmatmul.mubr.bf16.gmra.mrb[20].mxu1 %v429_v25  ;;  %v434_v47 = vpack.c.bf16 %v1560_v39, %v1839_v28  ;;  %v1399_v52 = vpop.f32.mrb[12].mxu1  ;;  %v77_v25 = vld [vmem:[#allocation2 + $0x48] sm:$0x1] }
 0x108   :  { %v1564_v48 = vpop.eup %1563  ;;  %1583 = vtanh.f32 %v327_v40  ;;  %v388_v55 = vadd.f32 %v1399_v52, %v1814_v35  ;;  %v379_v56 = vpop.f32.mrb[13].mxu1  ;;  %v442_v26 = vunpack.c.l.bf16 %v77_v25 }
 0x109   :  { %v1566_v50 = vpop.eup %1565  ;;  %1585 = vtanh.f32 %v319_v45  ;;  %v380_v59 = vadd.f32 %v379_v56, %v1814_v35  ;;  %v1400_v60 = vpop.f32.mrb[14].mxu1  ;;  %1460 = vmatpush3.bf16.msra.mxu0 %v1534_v22 }
 0x10a   :  { %v1568_v51 = vpop.eup %1567  ;;  %1587 = vtanh.f32 %v364_v42  ;;  %v391_v62 = vadd.f32 %v1400_v60, %v1814_v35  ;;  %v382_v63 = vpop.f32.mrb[15].mxu1  ;;  %1461 = vmatprep.subr.bf16.mxu0 %v1535_v23  ;;  %v1858_v27 = vrot.slane %v442_v26, %v1811_v34 }
 0x10b   :  { %v1570_v53 = vpop.eup %1569  ;;  %v431_v54 = vpack.c.bf16 %v1568_v51, %v1564_v48  ;;  %1589 = vtanh.f32 %v375_v46  ;;  %v383_v1 = vadd.f32 %v382_v63, %v1814_v35 }
 0x10c   :  { %v1572_v57 = vpop.eup %1571  ;;  %v430_v58 = vpack.c.bf16 %v1570_v53, %v1566_v50  ;;  %1591 = vtanh.f32 %v367_v49 }
 0x10d   :  { %v1574_v61 = vpop.eup %1573  ;;  %1593 = vtanh.f32 %v388_v55  ;;  %1462 = vmatpush3.bf16.msra.mxu0 %v1535_v23 }
 0x10e   :  { %v1576_v0 = vpop.eup %1575  ;;  %1425 = vmatprep.mubr.bf16.mxu1 %v430_v58  ;;  %1595 = vtanh.f32 %v380_v59  ;;  %v437_v2 = vpack.c.bf16 %v1574_v61, %v1562_v44  ;;  %1463 = vmatprep.subr.bf16.mxu0 %v1536_v24 }
 0x10f   :  { %v1578_v3 = vpop.eup %1577  ;;  %1426 = vmatmul.mubr.bf16.gmra.mrb[24].mxu1 %v431_v54  ;;  %1597 = vtanh.f32 %v391_v62  ;;  %v436_v4 = vpack.c.bf16 %v1576_v0, %v1572_v57 }
 0x110   :  { %v1580_v5 = vpop.eup %1579  ;;  %1599 = vtanh.f32 %v383_v1 }
 0x111   :  { %v1582_v6 = vpop.eup %1581  ;;  %1464 = vmatpush3.bf16.msra.mxu0 %v1536_v24 }
 0x112   :  { %v1584_v7 = vpop.eup %1583 }
 0x113   :  { %v1586_v8 = vpop.eup %1585  ;;  %v433_v9 = vpack.c.bf16 %v1584_v7, %v1580_v5 }
 0x114   :  { %v1588_v10 = vpop.eup %1587  ;;  %v432_v11 = vpack.c.bf16 %v1586_v8, %v1582_v6 }
 0x115   :  { %v1590_v12 = vpop.eup %1589 }
 0x116   :  { %v1592_v13 = vpop.eup %1591  ;;  %1429 = vmatprep.mubr.bf16.mxu1 %v432_v11  ;;  %v439_v14 = vpack.c.bf16 %v1590_v12, %v1578_v3 }
 0x117   :  { %v1594_v15 = vpop.eup %1593  ;;  %1430 = vmatmul.mubr.bf16.gmra.mrb[28].mxu1 %v433_v9  ;;  %v438_v35 = vpack.c.bf16 %v1592_v13, %v1588_v10 }
 0x118   :  { %v1596_v16 = vpop.eup %1595  ;;  %1433 = vmatprep.mubr.bf16.mxu1 %v434_v47 }
 0x119   :  { %v1598_v17 = vpop.eup %1597 }
 0x11a   :  { %v1600_v18 = vpop.eup %1599  ;;  %v441_v19 = vpack.c.bf16 %v1598_v17, %v1594_v15 }
 0x11b   :  { %v440_v20 = vpack.c.bf16 %v1600_v18, %v1596_v16 }
 0x11f   :  { %1434 = vmatmul.mubr.bf16.gmra.mrb[32].mxu1 %v435_v43 }
 0x120   :  { %1437 = vmatprep.mubr.bf16.mxu1 %v436_v4 }
 0x127   :  { %1438 = vmatmul.mubr.bf16.gmra.mrb[36].mxu1 %v437_v2 }
 0x128   :  { %1441 = vmatprep.mubr.bf16.mxu1 %v438_v35 }
 0x12f   :  { %1442 = vmatmul.mubr.bf16.gmra.mrb[40].mxu1 %v439_v14 }
 0x130   :  { %1445 = vmatprep.mubr.bf16.mxu1 %v440_v20 }
 0x137   :  { %1446 = vmatmul.mubr.bf16.gmra.mrb[44].mxu1 %v441_v19 }
 0x1d2   :  { %v1419_v28 = vpop.f32.mrb[16].mxu1 }
 0x1d3   :  { %v538_v29 = vadd.f32 %v1419_v28, %v1858_v27  ;;  %v529_v30 = vpop.f32.mrb[17].mxu1 }
 0x1d4   :  { %v530_v31 = vadd.f32 %v529_v30, %v1858_v27  ;;  %v1420_v32 = vpop.f32.mrb[18].mxu1 }
 0x1d5   :  { %1601 = vtanh.f32 %v538_v29  ;;  %v541_v33 = vadd.f32 %v1420_v32, %v1858_v27  ;;  %v532_v36 = vpop.f32.mrb[19].mxu1 }
 0x1d6   :  { %1603 = vtanh.f32 %v530_v31  ;;  %v533_v37 = vadd.f32 %v532_v36, %v1858_v27 }
 0x1d7   :  { %1605 = vtanh.f32 %v541_v33 }
 0x1d8   :  { %1607 = vtanh.f32 %v533_v37 }
 0x1da   :  { %v1423_v38 = vpop.f32.mrb[20].mxu1 }
 0x1db   :  { %v554_v39 = vadd.f32 %v1423_v38, %v1858_v27  ;;  %v545_v40 = vpop.f32.mrb[21].mxu1 }
 0x1dc   :  { %v546_v41 = vadd.f32 %v545_v40, %v1858_v27  ;;  %v1424_v42 = vpop.f32.mrb[22].mxu1 }
 0x1dd   :  { %1609 = vtanh.f32 %v554_v39  ;;  %v557_v43 = vadd.f32 %v1424_v42, %v1858_v27  ;;  %v548_v44 = vpop.f32.mrb[23].mxu1 }
 0x1de   :  { %1611 = vtanh.f32 %v546_v41  ;;  %v549_v45 = vadd.f32 %v548_v44, %v1858_v27 }
 0x1df   :  { %v1602_v46 = vpop.eup %1601  ;;  %1613 = vtanh.f32 %v557_v43 }
 0x1e0   :  { %v1604_v47 = vpop.eup %1603  ;;  %1615 = vtanh.f32 %v549_v45 }
 0x1e1   :  { %v1606_v48 = vpop.eup %1605 }
 0x1e2   :  { %v1608_v49 = vpop.eup %1607  ;;  %v1427_v50 = vpop.f32.mrb[24].mxu1  ;;  %v689_v51 = vpack.c.bf16 %v1606_v48, %v1602_v46 }
 0x1e3   :  { %v570_v52 = vadd.f32 %v1427_v50, %v1858_v27  ;;  %v561_v53 = vpop.f32.mrb[25].mxu1  ;;  %v688_v54 = vpack.c.bf16 %v1608_v49, %v1604_v47 }
 0x1e4   :  { %v562_v55 = vadd.f32 %v561_v53, %v1858_v27  ;;  %v1428_v56 = vpop.f32.mrb[26].mxu1 }
 0x1e5   :  { %1617 = vtanh.f32 %v570_v52  ;;  %v573_v57 = vadd.f32 %v1428_v56, %v1858_v27  ;;  %v564_v58 = vpop.f32.mrb[27].mxu1  ;;  %1465 = vmatprep.mubr.bf16.mxu0 %v688_v54 }
 0x1e6   :  { %1619 = vtanh.f32 %v562_v55  ;;  %v565_v59 = vadd.f32 %v564_v58, %v1858_v27  ;;  %1466 = vmatmul.mubr.bf16.vlgmr.msra.gmra.mrb[16].mxu0 %v689_v51 }
 0x1e7   :  { %v1610_v60 = vpop.eup %1609  ;;  %1621 = vtanh.f32 %v573_v57 }
 0x1e8   :  { %v1612_v61 = vpop.eup %1611  ;;  %1623 = vtanh.f32 %v565_v59 }
 0x1e9   :  { %v1614_v62 = vpop.eup %1613 }
 0x1ea   :  { %v1616_v63 = vpop.eup %1615  ;;  %v1431_v0 = vpop.f32.mrb[28].mxu1  ;;  %v691_v1 = vpack.c.bf16 %v1614_v62, %v1610_v60 }
 0x1eb   :  { %v586_v2 = vadd.f32 %v1431_v0, %v1858_v27  ;;  %v577_v3 = vpop.f32.mrb[29].mxu1  ;;  %v690_v4 = vpack.c.bf16 %v1616_v63, %v1612_v61 }
 0x1ec   :  { %v578_v5 = vadd.f32 %v577_v3, %v1858_v27  ;;  %v1432_v6 = vpop.f32.mrb[30].mxu1 }
 0x1ed   :  { %1625 = vtanh.f32 %v586_v2  ;;  %v589_v7 = vadd.f32 %v1432_v6, %v1858_v27  ;;  %v580_v8 = vpop.f32.mrb[31].mxu1  ;;  %1469 = vmatprep.mubr.bf16.mxu0 %v690_v4 }
 0x1ee   :  { %1627 = vtanh.f32 %v578_v5  ;;  %v581_v9 = vadd.f32 %v580_v8, %v1858_v27  ;;  %1470 = vmatmul.mubr.bf16.gmra.mrb[20].mxu0 %v691_v1 }
 0x1ef   :  { %v1618_v10 = vpop.eup %1617  ;;  %1629 = vtanh.f32 %v589_v7 }
 0x1f0   :  { %v1620_v11 = vpop.eup %1619  ;;  %1631 = vtanh.f32 %v581_v9 }
 0x1f1   :  { %v1622_v12 = vpop.eup %1621 }
 0x1f2   :  { %v1624_v13 = vpop.eup %1623  ;;  %v1435_v14 = vpop.f32.mrb[32].mxu1  ;;  %v693_v15 = vpack.c.bf16 %v1622_v12, %v1618_v10 }
 0x1f3   :  { %v602_v35 = vadd.f32 %v1435_v14, %v1858_v27  ;;  %v593_v16 = vpop.f32.mrb[33].mxu1  ;;  %v692_v17 = vpack.c.bf16 %v1624_v13, %v1620_v11 }
 0x1f4   :  { %v594_v18 = vadd.f32 %v593_v16, %v1858_v27  ;;  %v1436_v19 = vpop.f32.mrb[34].mxu1 }
 0x1f5   :  { %1633 = vtanh.f32 %v602_v35  ;;  %v605_v20 = vadd.f32 %v1436_v19, %v1858_v27  ;;  %v596_v21 = vpop.f32.mrb[35].mxu1  ;;  %1473 = vmatprep.mubr.bf16.mxu0 %v692_v17 }
 0x1f6   :  { %1635 = vtanh.f32 %v594_v18  ;;  %v597_v22 = vadd.f32 %v596_v21, %v1858_v27  ;;  %1474 = vmatmul.mubr.bf16.gmra.mrb[24].mxu0 %v693_v15 }
 0x1f7   :  { %v1626_v23 = vpop.eup %1625  ;;  %1637 = vtanh.f32 %v605_v20 }
 0x1f8   :  { %v1628_v24 = vpop.eup %1627  ;;  %1639 = vtanh.f32 %v597_v22 }
 0x1f9   :  { %v1630_v25 = vpop.eup %1629 }
 0x1fa   :  { %v1632_v26 = vpop.eup %1631  ;;  %v1439_v28 = vpop.f32.mrb[36].mxu1  ;;  %v695_v29 = vpack.c.bf16 %v1630_v25, %v1626_v23 }
 0x1fb   :  { %v618_v30 = vadd.f32 %v1439_v28, %v1858_v27  ;;  %v609_v31 = vpop.f32.mrb[37].mxu1  ;;  %v694_v32 = vpack.c.bf16 %v1632_v26, %v1628_v24 }
 0x1fc   :  { %v610_v33 = vadd.f32 %v609_v31, %v1858_v27  ;;  %v1440_v36 = vpop.f32.mrb[38].mxu1 }
 0x1fd   :  { %1641 = vtanh.f32 %v618_v30  ;;  %v621_v37 = vadd.f32 %v1440_v36, %v1858_v27  ;;  %v612_v38 = vpop.f32.mrb[39].mxu1  ;;  %1477 = vmatprep.mubr.bf16.mxu0 %v694_v32 }
 0x1fe   :  { %1643 = vtanh.f32 %v610_v33  ;;  %v613_v39 = vadd.f32 %v612_v38, %v1858_v27  ;;  %1478 = vmatmul.mubr.bf16.gmra.mrb[28].mxu0 %v695_v29 }
 0x1ff   :  { %v1634_v40 = vpop.eup %1633  ;;  %1645 = vtanh.f32 %v621_v37 }
 0x200   :  { %v1636_v41 = vpop.eup %1635  ;;  %1647 = vtanh.f32 %v613_v39 }
 0x201   :  { %v1638_v42 = vpop.eup %1637 }
 0x202   :  { %v1640_v43 = vpop.eup %1639  ;;  %v1443_v44 = vpop.f32.mrb[40].mxu1  ;;  %v697_v45 = vpack.c.bf16 %v1638_v42, %v1634_v40 }
 0x203   :  { %v634_v46 = vadd.f32 %v1443_v44, %v1858_v27  ;;  %v625_v47 = vpop.f32.mrb[41].mxu1  ;;  %v696_v48 = vpack.c.bf16 %v1640_v43, %v1636_v41 }
 0x204   :  { %v626_v49 = vadd.f32 %v625_v47, %v1858_v27  ;;  %v1444_v50 = vpop.f32.mrb[42].mxu1 }
 0x205   :  { %1649 = vtanh.f32 %v634_v46  ;;  %v637_v51 = vadd.f32 %v1444_v50, %v1858_v27  ;;  %v628_v52 = vpop.f32.mrb[43].mxu1  ;;  %1481 = vmatprep.mubr.bf16.mxu0 %v696_v48 }
 0x206   :  { %1651 = vtanh.f32 %v626_v49  ;;  %v629_v53 = vadd.f32 %v628_v52, %v1858_v27  ;;  %1482 = vmatmul.mubr.bf16.gmra.mrb[32].mxu0 %v697_v45 }
 0x207   :  { %v1642_v54 = vpop.eup %1641  ;;  %1653 = vtanh.f32 %v637_v51 }
 0x208   :  { %v1644_v55 = vpop.eup %1643  ;;  %1655 = vtanh.f32 %v629_v53 }
 0x209   :  { %v1646_v56 = vpop.eup %1645 }
 0x20a   :  { %v1648_v57 = vpop.eup %1647  ;;  %v1447_v58 = vpop.f32.mrb[44].mxu1  ;;  %v699_v59 = vpack.c.bf16 %v1646_v56, %v1642_v54 }
 0x20b   :  { %v650_v60 = vadd.f32 %v1447_v58, %v1858_v27  ;;  %v641_v61 = vpop.f32.mrb[45].mxu1  ;;  %v698_v62 = vpack.c.bf16 %v1648_v57, %v1644_v55 }
 0x20c   :  { %v642_v63 = vadd.f32 %v641_v61, %v1858_v27  ;;  %v1448_v0 = vpop.f32.mrb[46].mxu1 }
 0x20d   :  { %1657 = vtanh.f32 %v650_v60  ;;  %v653_v1 = vadd.f32 %v1448_v0, %v1858_v27  ;;  %v644_v2 = vpop.f32.mrb[47].mxu1  ;;  %1485 = vmatprep.mubr.bf16.mxu0 %v698_v62 }
 0x20e   :  { %1659 = vtanh.f32 %v642_v63  ;;  %v645_v3 = vadd.f32 %v644_v2, %v1858_v27  ;;  %1486 = vmatmul.mubr.bf16.gmra.mrb[36].mxu0 %v699_v59  ;;  %v94_v27 = vld [vmem:[#allocation2 + $0x8c] sm:$0x1] }
 0x20f   :  { %v1650_v4 = vpop.eup %1649  ;;  %1661 = vtanh.f32 %v653_v1  ;;  %v704_v35 = vunpack.c.l.bf16 %v94_v27 }
 0x210   :  { %v1652_v5 = vpop.eup %1651  ;;  %1663 = vtanh.f32 %v645_v3 }
 0x211   :  { %v1654_v6 = vpop.eup %1653  ;;  %v1893_v16 = vrot.slane %v704_v35, %v1811_v34 }
 0x212   :  { %v1656_v7 = vpop.eup %1655  ;;  %v701_v8 = vpack.c.bf16 %v1654_v6, %v1650_v4 }
 0x213   :  { %v700_v9 = vpack.c.bf16 %v1656_v7, %v1652_v5 }
 0x215   :  { %1489 = vmatprep.mubr.bf16.mxu0 %v700_v9 }
 0x216   :  { %1490 = vmatmul.mubr.bf16.gmra.mrb[40].mxu0 %v701_v8 }
 0x217   :  { %v1658_v10 = vpop.eup %1657 }
 0x218   :  { %v1660_v11 = vpop.eup %1659 }
 0x219   :  { %v1662_v12 = vpop.eup %1661 }
 0x21a   :  { %v1664_v13 = vpop.eup %1663  ;;  %v703_v14 = vpack.c.bf16 %v1662_v12, %v1658_v10 }
 0x21b   :  { %v702_v15 = vpack.c.bf16 %v1664_v13, %v1660_v11 }
 0x21d   :  { %1493 = vmatprep.mubr.bf16.mxu0 %v702_v15 }
 0x21e   :  { %1494 = vmatmul.mubr.bf16.gmra.mrb[44].mxu0 %v703_v14 }
 0x2b9   :  { %v1467_v17 = vpop.f32.mrb[16].mxu0 }
 0x2ba   :  { %v791_v18 = vpop.f32.mrb[17].mxu0  ;;  %v800_v20 = vadd.f32 %v1467_v17, %v1893_v16 }
 0x2bb   :  { %v1468_v19 = vpop.f32.mrb[18].mxu0  ;;  %v792_v23 = vadd.f32 %v791_v18, %v1893_v16 }
 0x2bc   :  { %v803_v21 = vadd.f32 %v1468_v19, %v1893_v16  ;;  %v794_v22 = vpop.f32.mrb[19].mxu0 }
 0x2bd   :  { %v795_v24 = vadd.f32 %v794_v22, %v1893_v16 }
 0x2be   :  { %v1215_v25 = vpack.c.bf16 %v803_v21, %v800_v20 }
 0x2bf   :  { %v1210_v26 = vpack.c.bf16 %v795_v24, %v792_v23 }
 0x2c0   :  { %1287 = vst [vmem:[#allocation5 + $0x8] sm:$0xff] %v1215_v25  }
 0x2c1   :  { %1211 = vst [vmem:[#allocation5] sm:$0xff] %v1210_v26   ;;  %v1471_v28 = vpop.f32.mrb[20].mxu0 }
 0x2c2   :  { %v807_v29 = vpop.f32.mrb[21].mxu0  ;;  %v816_v30 = vadd.f32 %v1471_v28, %v1893_v16 }
 0x2c3   :  { %v1472_v34 = vpop.f32.mrb[22].mxu0  ;;  %v808_v33 = vadd.f32 %v807_v29, %v1893_v16 }
 0x2c4   :  { %v819_v31 = vadd.f32 %v1472_v34, %v1893_v16  ;;  %v810_v32 = vpop.f32.mrb[23].mxu0 }
 0x2c5   :  { %v811_v36 = vadd.f32 %v810_v32, %v1893_v16 }
 0x2c6   :  { %v1225_v37 = vpack.c.bf16 %v819_v31, %v816_v30 }
 0x2c7   :  { %v1220_v38 = vpack.c.bf16 %v811_v36, %v808_v33 }
 0x2c8   :  { %1289 = vst [vmem:[#allocation5 + $0x18] sm:$0xff] %v1225_v37  }
 0x2c9   :  { %1288 = vst [vmem:[#allocation5 + $0x10] sm:$0xff] %v1220_v38   ;;  %v1475_v39 = vpop.f32.mrb[24].mxu0 }
 0x2ca   :  { %v823_v40 = vpop.f32.mrb[25].mxu0  ;;  %v832_v42 = vadd.f32 %v1475_v39, %v1893_v16 }
 0x2cb   :  { %v1476_v41 = vpop.f32.mrb[26].mxu0  ;;  %v824_v45 = vadd.f32 %v823_v40, %v1893_v16 }
 0x2cc   :  { %v835_v43 = vadd.f32 %v1476_v41, %v1893_v16  ;;  %v826_v44 = vpop.f32.mrb[27].mxu0 }
 0x2cd   :  { %v827_v46 = vadd.f32 %v826_v44, %v1893_v16 }
 0x2ce   :  { %v1235_v47 = vpack.c.bf16 %v835_v43, %v832_v42 }
 0x2cf   :  { %v1230_v48 = vpack.c.bf16 %v827_v46, %v824_v45 }
 0x2d0   :  { %1291 = vst [vmem:[#allocation5 + $0x28] sm:$0xff] %v1235_v47  }
 0x2d1   :  { %1290 = vst [vmem:[#allocation5 + $0x20] sm:$0xff] %v1230_v48   ;;  %v1479_v49 = vpop.f32.mrb[28].mxu0 }
 0x2d2   :  { %v839_v50 = vpop.f32.mrb[29].mxu0  ;;  %v848_v52 = vadd.f32 %v1479_v49, %v1893_v16 }
 0x2d3   :  { %v1480_v51 = vpop.f32.mrb[30].mxu0  ;;  %v840_v55 = vadd.f32 %v839_v50, %v1893_v16 }
 0x2d4   :  { %v851_v53 = vadd.f32 %v1480_v51, %v1893_v16  ;;  %v842_v54 = vpop.f32.mrb[31].mxu0 }
 0x2d5   :  { %v843_v56 = vadd.f32 %v842_v54, %v1893_v16 }
 0x2d6   :  { %v1245_v57 = vpack.c.bf16 %v851_v53, %v848_v52 }
 0x2d7   :  { %v1240_v58 = vpack.c.bf16 %v843_v56, %v840_v55 }
 0x2d8   :  { %1293 = vst [vmem:[#allocation5 + $0x38] sm:$0xff] %v1245_v57  }
 0x2d9   :  { %1292 = vst [vmem:[#allocation5 + $0x30] sm:$0xff] %v1240_v58   ;;  %v1483_v59 = vpop.f32.mrb[32].mxu0 }
 0x2da   :  { %v855_v60 = vpop.f32.mrb[33].mxu0  ;;  %v864_v62 = vadd.f32 %v1483_v59, %v1893_v16 }
 0x2db   :  { %v1484_v61 = vpop.f32.mrb[34].mxu0  ;;  %v856_v1 = vadd.f32 %v855_v60, %v1893_v16 }
 0x2dc   :  { %v867_v63 = vadd.f32 %v1484_v61, %v1893_v16  ;;  %v858_v0 = vpop.f32.mrb[35].mxu0 }
 0x2dd   :  { %v859_v2 = vadd.f32 %v858_v0, %v1893_v16 }
 0x2de   :  { %v1255_v3 = vpack.c.bf16 %v867_v63, %v864_v62 }
 0x2df   :  { %v1250_v4 = vpack.c.bf16 %v859_v2, %v856_v1 }
 0x2e0   :  { %1295 = vst [vmem:[#allocation5 + $0x48] sm:$0xff] %v1255_v3  }
 0x2e1   :  { %1294 = vst [vmem:[#allocation5 + $0x40] sm:$0xff] %v1250_v4   ;;  %v1487_v5 = vpop.f32.mrb[36].mxu0 }
 0x2e2   :  { %v871_v6 = vpop.f32.mrb[37].mxu0  ;;  %v880_v8 = vadd.f32 %v1487_v5, %v1893_v16 }
 0x2e3   :  { %v1488_v7 = vpop.f32.mrb[38].mxu0  ;;  %v872_v11 = vadd.f32 %v871_v6, %v1893_v16 }
 0x2e4   :  { %v883_v9 = vadd.f32 %v1488_v7, %v1893_v16  ;;  %v874_v10 = vpop.f32.mrb[39].mxu0 }
 0x2e5   :  { %v875_v12 = vadd.f32 %v874_v10, %v1893_v16 }
 0x2e6   :  { %v1265_v13 = vpack.c.bf16 %v883_v9, %v880_v8 }
 0x2e7   :  { %v1260_v14 = vpack.c.bf16 %v875_v12, %v872_v11 }
 0x2e8   :  { %1297 = vst [vmem:[#allocation5 + $0x58] sm:$0xff] %v1265_v13  }
 0x2e9   :  { %1296 = vst [vmem:[#allocation5 + $0x50] sm:$0xff] %v1260_v14   ;;  %v1491_v15 = vpop.f32.mrb[40].mxu0 }
 0x2ea   :  { %v887_v27 = vpop.f32.mrb[41].mxu0  ;;  %v896_v17 = vadd.f32 %v1491_v15, %v1893_v16 }
 0x2eb   :  { %v1492_v35 = vpop.f32.mrb[42].mxu0  ;;  %v888_v20 = vadd.f32 %v887_v27, %v1893_v16 }
 0x2ec   :  { %v899_v18 = vadd.f32 %v1492_v35, %v1893_v16  ;;  %v890_v19 = vpop.f32.mrb[43].mxu0 }
 0x2ed   :  { %v891_v21 = vadd.f32 %v890_v19, %v1893_v16 }
 0x2ee   :  { %v1275_v22 = vpack.c.bf16 %v899_v18, %v896_v17 }
 0x2ef   :  { %v1270_v23 = vpack.c.bf16 %v891_v21, %v888_v20 }
 0x2f0   :  { %1299 = vst [vmem:[#allocation5 + $0x68] sm:$0xff] %v1275_v22  }
 0x2f1   :  { %1298 = vst [vmem:[#allocation5 + $0x60] sm:$0xff] %v1270_v23   ;;  %v1495_v24 = vpop.f32.mrb[44].mxu0 }
 0x2f2   :  { %v903_v25 = vpop.f32.mrb[45].mxu0  ;;  %v912_v28 = vadd.f32 %v1495_v24, %v1893_v16 }
 0x2f3   :  { %v1496_v26 = vpop.f32.mrb[46].mxu0  ;;  %v904_v30 = vadd.f32 %v903_v25, %v1893_v16 }
 0x2f4   :  { %v915_v29 = vadd.f32 %v1496_v26, %v1893_v16  ;;  %v906_v34 = vpop.f32.mrb[47].mxu0 }
 0x2f5   :  { %v907_v31 = vadd.f32 %v906_v34, %v1893_v16 }
 0x2f6   :  { %v1285_v32 = vpack.c.bf16 %v915_v29, %v912_v28 }
 0x2f7   :  { %v1280_v33 = vpack.c.bf16 %v907_v31, %v904_v30 }
 0x2f8   :  { %1301 = vst [vmem:[#allocation5 + $0x78] sm:$0xff] %v1285_v32  }
 0x2f9   :  { %1300 = vst [vmem:[#allocation5 + $0x70] sm:$0xff] %v1280_v33  }
 0x2fa   :  { %1698 = shalt.err (!%p1695_p12)
}
 0x2fb   :  { %s1699_s3 = scalar_lea.hbm %s1944_s2, 2048 }
 0x2fc   :  { %p1700_p13 = scmp.ne.s32.totalorder %s1944_s2, %s1699_s3  ;;  %p1703_p0 = scmp.lt.u32.totalorder %s1699_s3, %s1944_s2 }
 0x2fe   :  { %p1705_p1 = pnand %p1703_p0, %p1700_p13 }
 0x300   :  { %1708 = shalt.err (!%p1705_p1)
}
 0x301   :  { %1089 = dma.vmem_to_hbm [thread:$0]  %s1084_s27, 2048, %s1944_s2, [#allocation4], %s1714_s19, %s1714_s19, %s1715_s20  }
 0x302   :  { %1711 = dma.done.wait [#allocation4], 2048  }
 0x303   :  { %1712 = vsyncadd [#allocation4], 4294965248 }
 0x304   :  { %1093 = vsyncpa [#allocation3], 1 }
 0x305   :  { %1094 = vsyncpa [#allocation4], 1 }

</bundles_post_ra>
